<compile_context>
chip_gen: v6e
topology: v6e:2x2x1
jax: 0.10.0
libtpu: 0.0.40
codegen_flags: <defaults>
</compile_context>

<pallas_src>
import jax
import jax.numpy as jnp
from jax.experimental import pallas as pl
from jax.experimental.pallas import tpu as pltpu

EPS = 1e-5  # torch.nn.LayerNorm default eps


def ln_linear_kernel(x_ref, w_ref, b_ref, o_ref):
    # x_ref: (TILE_B, F)   input rows
    # w_ref: (F, OUT)      linear weight (transposed) with LN gamma folded in
    # b_ref: (1, OUT)      linear bias with LN beta folded in
    # o_ref: (TILE_B, OUT) output tile in the module's natural layout
    x = x_ref[...].astype(jnp.float32)

    # LayerNorm over the feature axis (biased variance; affine folded away).
    mean = jnp.mean(x, axis=-1, keepdims=True)
    centered = x - mean
    var = jnp.mean(centered * centered, axis=-1, keepdims=True)
    x_norm = centered * jax.lax.rsqrt(var + EPS)

    # (TILE_B, F) @ (F, OUT) -> (TILE_B, OUT); add folded bias.
    y = jnp.dot(x_norm, w_ref[...], preferred_element_type=jnp.float32)
    o_ref[...] = (y + b_ref[...]).astype(o_ref.dtype)


def _round_up(a, m):
    return ((a + m - 1) // m) * m


def net_forward(x, gamma, beta, weight, bias, *, tile_b=8192):
    """x: (B, 20); gamma/beta: (20,); weight: (5, 20) (PyTorch layout); bias: (5,)."""
    B, F = x.shape
    OUT = weight.shape[0]

    # Fold LN affine into the linear layer (tiny, done once in the wrapper):
    #   (x_hat*gamma + beta) @ W^T + b == x_hat @ (gamma (.) W)^T + (W @ beta + b)
    w_t = (weight * gamma[None, :]).T.astype(jnp.float32)          # (F, OUT)
    b_row = (weight @ beta + bias).astype(jnp.float32).reshape(1, OUT)

    # Tile selection:
    #  * B <= 8: a single full-array block (full dims bypass the (8,128) rule).
    #  * otherwise: at least 2 tiles (keeps both v7x TensorCores busy), capped
    #    at tile_b so the lane-padded VMEM buffers stay within budget.
    if B <= 8:
        tile = B
    else:
        tile = min(tile_b, max(8, _round_up(pl.cdiv(B, 2), 8)))
    b_pad = _round_up(B, tile)
    n_tiles = b_pad // tile

    # Pad batch only when the tile doesn't divide it. Zero rows stay finite
    # through LayerNorm (var=0 -> rsqrt(eps)) and are sliced off afterwards.
    xp = x if b_pad == B else jnp.pad(x, ((0, b_pad - B), (0, 0)))

    out = pl.pallas_call(
        ln_linear_kernel,
        out_shape=jax.ShapeDtypeStruct((b_pad, OUT), x.dtype),
        grid=(n_tiles,),
        in_specs=[
            pl.BlockSpec((tile, F), lambda i: (i, 0)),   # x tiles stream (double-buffered)
            pl.BlockSpec((F, OUT), lambda i: (0, 0)),    # folded weight, VMEM-resident
            pl.BlockSpec((1, OUT), lambda i: (0, 0)),    # folded bias, VMEM-resident
        ],
        out_specs=pl.BlockSpec((tile, OUT), lambda i: (i, 0)),
        compiler_params=pltpu.CompilerParams(
            dimension_semantics=("parallel",),
            # tile=8192 -> ~16 MiB of lane-padded x/out double buffers; 32 MiB
            # gives 2x headroom, raises v5e's 16 MiB default, fits v7x physical.
            vmem_limit_bytes=32 * 1024 * 1024,
        ),
    )(xp, w_t, b_row)

    return out if b_pad == B else out[:B]


def _reference(x, gamma, beta, weight, bias):
    mean = jnp.mean(x, axis=-1, keepdims=True)
    var = jnp.mean((x - mean) ** 2, axis=-1, keepdims=True)
    x_norm = ((x - mean) / jnp.sqrt(var + EPS)) * gamma + beta
    return x_norm @ weight.T + bias


if __name__ == "__main__":
    key = jax.random.PRNGKey(0)
    k_x, k_w, k_b, k_g, k_be, k_x2, k_x3 = jax.random.split(key, 7)

    B, F, OUT = 8, 20, 5

    x = jax.random.normal(k_x, (B, F), dtype=jnp.float32)
    # Non-trivial LN affine so the gamma/beta folding is actually exercised.
    gamma = 1.0 + 0.1 * jax.random.normal(k_g, (F,), dtype=jnp.float32)
    beta = 0.1 * jax.random.normal(k_be, (F,), dtype=jnp.float32)
    bound = 1.0 / jnp.sqrt(jnp.float32(F))
    weight = jax.random.uniform(k_w, (OUT, F), jnp.float32, -bound, bound)
    bias = jax.random.uniform(k_b, (OUT,), jnp.float32, -bound, bound)

    # 1) Small batch: single full-array block.
    out = net_forward(x, gamma, beta, weight, bias)
    jax.block_until_ready(out)
    ref = _reference(x, gamma, beta, weight, bias)
    assert out.shape == (B, OUT)
    assert jnp.allclose(out, ref, atol=1e-5, rtol=1e-5), "mismatch (small B)"

    # 2) Mid-size batch, exact 2-way split (no padding): exercises the grid path.
    B2 = 1024
    x2 = jax.random.normal(k_x2, (B2, F), dtype=jnp.float32)
    out2 = net_forward(x2, gamma, beta, weight, bias)
    jax.block_until_ready(out2)
    ref2 = _reference(x2, gamma, beta, weight, bias)
    assert out2.shape == (B2, OUT)
    assert jnp.allclose(out2, ref2, atol=1e-5, rtol=1e-5), "mismatch (B=1024)"

    # 3) Non-divisible batch: exercises pad + output slice path.
    B3 = 100
    x3 = jax.random.normal(k_x3, (B3, F), dtype=jnp.float32)
    out3 = net_forward(x3, gamma, beta, weight, bias)
    jax.block_until_ready(out3)
    ref3 = _reference(x3, gamma, beta, weight, bias)
    assert out3.shape == (B3, OUT)
    assert jnp.allclose(out3, ref3, atol=1e-5, rtol=1e-5), "mismatch (B=100)"

    print("KERNEL_OK")
</pallas_src>

<mosaic_0001>
module attributes {stable_mosaic.version = 11 : i64} {
  func.func @ln_linear_kernel(%arg0: i32, %arg1: memref<8x20xf32, #tpu.memory_space<vmem>>, %arg2: memref<20x5xf32, #tpu.memory_space<vmem>>, %arg3: memref<1x5xf32, #tpu.memory_space<vmem>>, %arg4: memref<8x5xf32, #tpu.memory_space<vmem>>) attributes {dimension_semantics = [#tpu.dimension_semantics<parallel>], iteration_bounds = array<i64: 1>, scalar_prefetch = 0 : i64, scratch_operands = 0 : i64, tpu.core_type = #tpu.core_type<tc>, window_params = [{transform_indices = @transform_0, window_bounds = array<i64: 8, 20>}, {pipeline_mode = #tpu.pipeline_mode<synchronous>, transform_indices = @transform_1, window_bounds = array<i64: 20, 5>}, {pipeline_mode = #tpu.pipeline_mode<synchronous>, transform_indices = @transform_2, window_bounds = array<i64: 1, 5>}, {transform_indices = @transform_3, window_bounds = array<i64: 8, 5>}]} {
    %c0 = arith.constant 0 : index
    %c0_0 = arith.constant 0 : index
    %0 = vector.load %arg1[%c0, %c0_0] : memref<8x20xf32, #tpu.memory_space<vmem>>, vector<8x20xf32>
    %cst = arith.constant dense<0.000000e+00> : vector<8xf32>
    %1 = vector.multi_reduction <add>, %0, %cst [1] : vector<8x20xf32> to vector<8xf32>
    %2 = vector.shape_cast %1 : vector<8xf32> to vector<8x1xf32>
    %cst_1 = arith.constant 2.000000e+01 : f32
    %3 = vector.broadcast %cst_1 : f32 to vector<8x1xf32>
    %4 = arith.divf %2, %3 : vector<8x1xf32>
    %5 = vector.broadcast %4 : vector<8x1xf32> to vector<8x20xf32>
    %6 = arith.subf %0, %5 : vector<8x20xf32>
    %7 = arith.mulf %6, %6 : vector<8x20xf32>
    %cst_2 = arith.constant dense<0.000000e+00> : vector<8xf32>
    %8 = vector.multi_reduction <add>, %7, %cst_2 [1] : vector<8x20xf32> to vector<8xf32>
    %9 = vector.shape_cast %8 : vector<8xf32> to vector<8x1xf32>
    %cst_3 = arith.constant 2.000000e+01 : f32
    %10 = vector.broadcast %cst_3 : f32 to vector<8x1xf32>
    %11 = arith.divf %9, %10 : vector<8x1xf32>
    %cst_4 = arith.constant 9.99999974E-6 : f32
    %12 = vector.broadcast %cst_4 : f32 to vector<8x1xf32>
    %13 = arith.addf %11, %12 : vector<8x1xf32>
    %14 = math.rsqrt %13 : vector<8x1xf32>
    %15 = vector.broadcast %14 : vector<8x1xf32> to vector<8x20xf32>
    %16 = arith.mulf %6, %15 : vector<8x20xf32>
    %c0_5 = arith.constant 0 : index
    %c0_6 = arith.constant 0 : index
    %17 = vector.load %arg2[%c0_5, %c0_6] : memref<20x5xf32, #tpu.memory_space<vmem>>, vector<20x5xf32>
    %cst_7 = arith.constant dense<0.000000e+00> : vector<8x5xf32>
    %18 = tpu.matmul %16, %17, %cst_7 {dimension_numbers = #tpu.dot_dimension_numbers<[1], [0], [0], [1], [0, 0, 1, 1], [], []>} : vector<8x20xf32>, vector<20x5xf32>, vector<8x5xf32> -> vector<8x5xf32>
    %c0_8 = arith.constant 0 : index
    %c0_9 = arith.constant 0 : index
    %19 = vector.load %arg3[%c0_8, %c0_9] : memref<1x5xf32, #tpu.memory_space<vmem>>, vector<1x5xf32>
    %20 = vector.broadcast %19 : vector<1x5xf32> to vector<8x5xf32>
    %21 = arith.addf %18, %20 : vector<8x5xf32>
    %c0_10 = arith.constant 0 : index
    %c0_11 = arith.constant 0 : index
    %22 = vector.load %arg4[%c0_10, %c0_11] : memref<8x5xf32, #tpu.memory_space<vmem>>, vector<8x5xf32>
    tpu.vector_store %arg4[%c0_10, %c0_11], %21 {strides = array<i32>} : memref<8x5xf32, #tpu.memory_space<vmem>>, vector<8x5xf32>,
    return
  }
  func.func @transform_0(%arg0: i32) -> (i32, i32) {
    %c0_i32 = arith.constant 0 : i32
    %c0_i32_0 = arith.constant 0 : i32
    return %arg0, %c0_i32 : i32, i32
  }
  func.func @transform_1(%arg0: i32) -> (i32, i32) {
    %c0_i32 = arith.constant 0 : i32
    %c0_i32_0 = arith.constant 0 : i32
    %c0_i32_1 = arith.constant 0 : i32
    return %c0_i32, %c0_i32_0 : i32, i32
  }
  func.func @transform_2(%arg0: i32) -> (i32, i32) {
    %c0_i32 = arith.constant 0 : i32
    %c0_i32_0 = arith.constant 0 : i32
    %c0_i32_1 = arith.constant 0 : i32
    return %c0_i32, %c0_i32_0 : i32, i32
  }
  func.func @transform_3(%arg0: i32) -> (i32, i32) {
    %c0_i32 = arith.constant 0 : i32
    %c0_i32_0 = arith.constant 0 : i32
    return %arg0, %c0_i32 : i32, i32
  }
}

</mosaic_0001>

<bundles_post_ra>
// kernel: tpu_custom_call.1
= control target key start
LH: loop header
LB: loop body
LE: loop exit
PB: predicated region body
PF: predicated region fallthrough
CT: control target
= control target key end

     0   :  { %vm16_vm0 = vcmask 162816   ;;  %s221_s0 = inlined_call_operand.vmem [shape: f32[8,20], index: 0, kind: input, shape index: {}]   ;;  %s222_s1 = inlined_call_operand.vmem [shape: f32[20,5], index: 1, kind: input, shape index: {}]   ;;  %s223_s2 = inlined_call_operand.vmem [shape: f32[1,5], index: 2, kind: input, shape index: {}]   ;;  %s224_s3 = inlined_call_operand.hbm [shape: f32[8,5], index: 3, kind: output, shape index: {}]  }
   0x1   :  { %v15_v0 = vld [vmem:[%s221_s0] sm:$0xff] }
   0x2   :  { %8 = vsyncpa [#allocation3], 0  ;;  %v17_v1 = vsel %vm16_vm0, %v15_v0, 0.0  ;;  %v33_v7 = vld [vmem:[%s222_s1 + $0x10] sm:$0xf]  ;;  %vm44_vm1 = vcmask 1043456  }
   0x3   :  { %18 = vadd.xlane.f32.xlu0 %v17_v1  ;;  %v177_v8 = vmov 0.0   ;;  %v32_v9 = vld [vmem:[%s222_s1 + $0x8] sm:$0xff]  ;;  %vm178_vm2 = vmmov 0   ;;  %v31_v10 = vld [vmem:[%s222_s1] sm:$0xff]  ;;  %s179_s21 = smov [#allocation2]   ;;  %vm118_vm3 = vcmask 39936  }
   0x4   :  { %141 = vmatprep.subr.mxu0 %v177_v8  ;;  %147 = vmatprep.mubr.msk.f32.mxu0 %vm178_vm2, %v177_v8  ;;  %v134_v16 = vld [vmem:[%s223_s2] ss:$0 sm:$0xff]  ;;  %s126_s22 = sshll.u32 %s179_s21, 4  ;;  %s127_s22 = int_to_ptr.vmem [resolvable:$true] %s126_s22 }
   0x5   :  { %142 = vmatpush3.msk.msra.mxu0 %vm44_vm1, %v33_v7  ;;  %s155_s1 = scalar_lea.vmem %s127_s22, 128  ;;  %p160_p1 = scmp.lt.s32.totalorder %s127_s22, %s127_s22 }
   0x6   :  { %143 = vmatprep.subr.mxu0 %v177_v8  ;;  %p156_p0 = scmp.ne.s32.totalorder %s127_s22, %s155_s1  ;;  %p161_p2 = scmp.lt.s32.totalorder %s155_s1, %s155_s1 }
   0x7   :  { %144 = vmatpush3.msra.mxu0 %v32_v9 }
   0x8   :  { %145 = vmatprep.subr.mxu0 %v177_v8  ;;  %p162_p3 = por %p161_p2, %p160_p1 }
   0x9   :  { %146 = vmatpush3.msra.mxu0 %v31_v10 }
   0xa   :  { %p163_p4 = pnand %p162_p3, %p156_p0 }
  0x8c   :  { %v19_v2 = vpop.xlane.xlu0 %18 }
  0x8d   :  { %v21_v3 = vmul.f32 0.05, %v19_v2 }
  0x8f   :  { %v22_v4 = vsub.f32 %v15_v0, %v21_v3 }
  0x91   :  { %v23_v5 = vmul.f32 %v22_v4, %v22_v4 }
  0x93   :  { %v24_v6 = vsel %vm16_vm0, %v23_v5, 0.0 }
  0x94   :  { %25 = vadd.xlane.f32.xlu0 %v24_v6 }
 0x11d   :  { %v26_v11 = vpop.xlane.xlu0 %25 }
 0x11e   :  { %v27_v12 = vmul.f32 0.05, %v26_v11 }
 0x120   :  { %v28_v13 = vadd.f32 1e-05, %v27_v12 }
 0x122   :  { %153 = vrsqrt.f32 %v28_v13 }
 0x12f   :  { %v154_v14 = vpop.eup %153 }
 0x130   :  { %v30_v15 = vmul.f32 %v154_v14, %v22_v4 }
 0x132   :  { %148 = vmatmul.mubr.msk.f32.vlgmr.msra.gmra.mxu0 %vm16_vm0, %v30_v15 }
 0x1f2   :  { %v114_v17 = vpop.f32.mrf.mxu0 }
 0x1f3   :  { %v115_v18 = vadd.f32 %v134_v16, %v114_v17 }
 0x1f4   :  { %v149_v19 = vpop.f32.mrf.mxu0 }
 0x1f5   :  { %119 = vst.msk [vmem:[#allocation2] sm:$0xff] %vm118_vm3, %v115_v18 }
 0x1f6   :  { %166 = shalt.err (!%p163_p4)
}
 0x1f7   :  { %129 = dma.vmem_to_hbm [thread:$0]  %s127_s22, 128, %s224_s3, [#allocation3]  }
 0x1f8   :  { %175 = dma.done.wait [#allocation3], 128  }
 0x1f9   :  { %176 = vsyncadd [#allocation3], 4294967168 }
 0x1fa   :  { %133 = vsyncpa [#allocation3], 1 }

</bundles_post_ra>
